<compile_context>
chip_gen: v5e
topology: v5e:2x2
jax: 0.10.0
libtpu: 0.0.40
codegen_flags: <defaults>
</compile_context>

<pallas_src>
import jax
import jax.numpy as jnp
from jax.experimental import pallas as pl
from jax.experimental.pallas import tpu as pltpu


def _rmsnorm_kernel(x_ref, w_ref, o_ref):
    """Standard path: d_model spans the whole lane width of the block (k == 1)."""
    x = x_ref[...].astype(jnp.float32)            # (tr, D)
    w = w_ref[...]                                # (1, D) f32, already weight/eps
    ss = jnp.sum(x * x, axis=-1, keepdims=True)   # (tr, 1)
    inv = jax.lax.rsqrt(ss)                       # EUP rsqrt: separate VLIW slot
    o_ref[...] = (x * inv * w).astype(o_ref.dtype)


def _rmsnorm_packed_kernel(x_ref, w_ref, seg_ref, o_ref):
    """Small-d_model path: k logical rows packed per 128-lane physical row."""
    x = x_ref[...].astype(jnp.float32)            # (tr, k*D)
    w = w_ref[...]                                # (1, k*D) f32, (weight/eps) tiled k times
    sq = x * x
    # Per-group (per logical row) sum of squares, broadcast back to every lane
    # of its group, via a block-diagonal 0/1 matrix on the MXU (stays lane-dense,
    # no in-kernel relayout).  Each output row depends only on its own input
    # row, so masked/garbage rows of a ragged final block never contaminate
    # valid rows.
    ss = jnp.dot(sq, seg_ref[...],
                 preferred_element_type=jnp.float32,
                 precision=jax.lax.Precision.HIGHEST)   # (tr, k*D)
    inv = jax.lax.rsqrt(ss)
    o_ref[...] = (x * inv * w).astype(o_ref.dtype)


def _vmem_capacity_bytes():
    """Physical VMEM of the local TPU generation; assume v7x (64 MiB) if unknown."""
    try:
        cap = int(pltpu.get_tpu_info().vmem_capacity_bytes)
        if 16 * 1024 * 1024 <= cap <= 1024 * 1024 * 1024:
            return cap
    except Exception:
        pass
    return 64 * 1024 * 1024


def rmsnorm(x, weight, eps=1e-5, *, tile_rows=None, vmem_limit_bytes=None):
    """x: (..., d_model), weight: (d_model,). Returns same shape/dtype as x.

    Matches torch: out = x / (x.norm(2, -1, keepdim=True) * eps) * weight.
    Note: an all-zero row yields NaN, exactly like the PyTorch reference.
    """
    orig_shape = x.shape
    d_model = orig_shape[-1]
    itemsize = jnp.dtype(x.dtype).itemsize
    x2 = x.reshape(-1, d_model)
    rows = x2.shape[0]

    # Lane packing factor: if d_model is a small divisor of 128, pack k logical
    # rows per physical row so every block is lane-dense (last dim = 128).
    if d_model < 128 and 128 % d_model == 0:
        k = 128 // d_model
    else:
        k = 1
    lane_width = k * d_model

    # Fold 1/eps into the weight once on the host (kernel computes in f32).
    w_scaled = (weight.astype(jnp.float32) / jnp.float32(eps)).reshape(1, d_model)
    w_packed = jnp.tile(w_scaled, (1, k))                       # (1, lane_width)

    # Lane packing needs rows % k == 0; pad by at most k-1 rows (edge case only;
    # the old tile-alignment padding copy over the whole array is gone).
    pad_rows = (-rows) % k
    if pad_rows:
        x2 = jnp.pad(x2, ((0, pad_rows), (0, 0)), constant_values=1)
    phys_rows = (rows + pad_rows) // k
    x_packed = x2.reshape(phys_rows, lane_width)   # contiguous merge: no copy

    # --- Tile sizing: dtype- and generation-aware --------------------------
    pack = max(8, 32 // itemsize)          # sublane pack: 8 f32, 16 bf16, 32 int8
    vmem_cap = _vmem_capacity_bytes()
    if vmem_cap <= 64 * 1024 * 1024:       # v7x-class: half the VMEM, 2x the HBM BW
        vmem_budget = 38 * 1024 * 1024
        default_limit = 48 * 1024 * 1024
    else:                                  # v5e / v6e: 128 MiB physical VMEM
        vmem_budget = 80 * 1024 * 1024
        default_limit = 100 * 1024 * 1024
    if vmem_limit_bytes is None:
        vmem_limit_bytes = default_limit

    if tile_rows is None:
        # ~4 MiB per I/O block (in the I/O dtype) amortizes the ~0.35 us
        # per-grid-step overhead; cap the row tile at 8192.
        t_bw = (4 * 1024 * 1024) // (lane_width * itemsize)
        # Resident VMEM ~= 2x in + 2x out blocks (I/O dtype) + f32 temporaries
        # (x_f32, sq, HIGHEST hi/lo splits, ss/out for the packed path).
        n_f32_tmp = 5 if k > 1 else 3
        per_row_bytes = lane_width * (4 * itemsize + 4 * n_f32_tmp)
        t_vm = vmem_budget // per_row_bytes
        tile_rows = min(t_bw, t_vm, 8192)
    tile_rows = max(pack, (tile_rows // pack) * pack)
    # Never allocate a block larger than (rounded-up) total rows.
    tile_rows = min(tile_rows, ((phys_rows + pack - 1) // pack) * pack)

    grid_rows = pl.cdiv(phys_rows, tile_rows)   # ragged last block is masked by Pallas

    row_spec = pl.BlockSpec((tile_rows, lane_width), lambda i: (i, 0))
    w_spec = pl.BlockSpec((1, lane_width), lambda i: (0, 0))

    # TODO(synk): if an xprof trace on v7x shows only one TensorCore busy, switch
    # this axis to pltpu.CORE_PARALLEL (or split via pl.core_map) for 2-TC sharding.
    compiler_params = pltpu.CompilerParams(
        dimension_semantics=("parallel",),
        vmem_limit_bytes=vmem_limit_bytes,
    )

    cost = pl.CostEstimate(
        flops=4 * rows * d_model
        + (2 * phys_rows * lane_width * lane_width if k > 1 else 0),
        transcendentals=rows,
        bytes_accessed=2 * rows * d_model * itemsize + d_model * 4,
    )

    out_shape = jax.ShapeDtypeStruct((phys_rows, lane_width), x.dtype)

    if k == 1:
        out = pl.pallas_call(
            _rmsnorm_kernel,
            out_shape=out_shape,
            grid_spec=pltpu.PrefetchScalarGridSpec(
                num_scalar_prefetch=0,
                grid=(grid_rows,),
                in_specs=[row_spec, w_spec],
                out_specs=row_spec,
            ),
            compiler_params=compiler_params,
            cost_estimate=cost,
        )(x_packed, w_packed)
    else:
        # Block-diagonal 0/1 matrix: seg[i, j] = 1 iff lanes i, j belong to the
        # same logical row (same contiguous group of d_model lanes).
        gid = jnp.arange(lane_width, dtype=jnp.int32) // d_model
        seg = (gid[:, None] == gid[None, :]).astype(jnp.float32)
        seg_spec = pl.BlockSpec((lane_width, lane_width), lambda i: (0, 0))
        out = pl.pallas_call(
            _rmsnorm_packed_kernel,
            out_shape=out_shape,
            grid_spec=pltpu.PrefetchScalarGridSpec(
                num_scalar_prefetch=0,
                grid=(grid_rows,),
                in_specs=[row_spec, w_spec, seg_spec],
                out_specs=row_spec,
            ),
            compiler_params=compiler_params,
            cost_estimate=cost,
        )(x_packed, w_packed, seg)

    out = out.reshape(phys_rows * k, d_model)
    if pad_rows:
        out = out[:rows]
    return out.reshape(orig_shape)


if __name__ == "__main__":
    eps = 1e-5

    # Packed path (d_model = 32 -> 4 logical rows per 128-lane physical row).
    key = jax.random.PRNGKey(0)
    batch, seq, d_model = 2, 8, 32
    x = jax.random.normal(key, (batch, seq, d_model), dtype=jnp.float32)
    weight = jnp.ones((d_model,), dtype=jnp.float32)   # nn.Parameter(torch.ones(d_model))
    out = jax.block_until_ready(rmsnorm(x, weight, eps))

    norm = jnp.linalg.norm(x, ord=2, axis=-1, keepdims=True)
    ref = x / (norm * eps) * weight
    assert out.shape == x.shape and out.dtype == x.dtype
    assert bool(jnp.all(jnp.isfinite(out)))
    assert jnp.allclose(out, ref, rtol=2e-3, atol=1e-2), "mismatch vs reference (packed path)"

    # k == 1 path (d_model >= 128), ragged row count (15 rows) exercises the
    # masked partial final block (no host-side padding pass any more).
    d2 = 256
    x_b = jax.random.normal(jax.random.PRNGKey(1), (3, 5, d2), dtype=jnp.float32)
    w_b = 1.0 + 0.1 * jax.random.normal(jax.random.PRNGKey(2), (d2,), dtype=jnp.float32)
    out_b = jax.block_until_ready(rmsnorm(x_b, w_b, eps))
    ref_b = x_b / (jnp.linalg.norm(x_b, ord=2, axis=-1, keepdims=True) * eps) * w_b
    assert jnp.allclose(out_b, ref_b, rtol=2e-3, atol=1e-2), "mismatch vs reference (k=1 path)"

    # Packed path with rows not a multiple of k (15 rows, k = 4): tiny k-pad only.
    x_c = jax.random.normal(jax.random.PRNGKey(3), (3, 5, d_model), dtype=jnp.float32)
    out_c = jax.block_until_ready(rmsnorm(x_c, weight, eps))
    ref_c = x_c / (jnp.linalg.norm(x_c, ord=2, axis=-1, keepdims=True) * eps) * weight
    assert jnp.allclose(out_c, ref_c, rtol=2e-3, atol=1e-2), "mismatch vs reference (packed ragged)"

    print("KERNEL_OK")
</pallas_src>

<mosaic_0001>
module attributes {stable_mosaic.version = 11 : i64} {
  func.func @_rmsnorm_packed_kernel(%arg0: i32, %arg1: memref<8x128xf32, #tpu.memory_space<vmem>>, %arg2: memref<1x128xf32, #tpu.memory_space<vmem>>, %arg3: memref<128x128xf32, #tpu.memory_space<vmem>>, %arg4: memref<8x128xf32, #tpu.memory_space<vmem>>) attributes {dimension_semantics = [#tpu.dimension_semantics<parallel>], iteration_bounds = array<i64: 1>, scalar_prefetch = 0 : i64, scratch_operands = 0 : i64, tpu.core_type = #tpu.core_type<tc>, window_params = [{transform_indices = @transform_0, window_bounds = array<i64: 8, 128>}, {pipeline_mode = #tpu.pipeline_mode<synchronous>, transform_indices = @transform_1, window_bounds = array<i64: 1, 128>}, {pipeline_mode = #tpu.pipeline_mode<synchronous>, transform_indices = @transform_2, window_bounds = array<i64: 128, 128>}, {transform_indices = @transform_3, window_bounds = array<i64: 8, 128>}]} {
    %c0 = arith.constant 0 : index
    %c0_0 = arith.constant 0 : index
    %0 = vector.load %arg1[%c0, %c0_0] : memref<8x128xf32, #tpu.memory_space<vmem>>, vector<8x128xf32>
    %c0_1 = arith.constant 0 : index
    %c0_2 = arith.constant 0 : index
    %1 = vector.load %arg2[%c0_1, %c0_2] : memref<1x128xf32, #tpu.memory_space<vmem>>, vector<1x128xf32>
    %2 = arith.mulf %0, %0 : vector<8x128xf32>
    %c0_3 = arith.constant 0 : index
    %c0_4 = arith.constant 0 : index
    %3 = vector.load %arg3[%c0_3, %c0_4] : memref<128x128xf32, #tpu.memory_space<vmem>>, vector<128x128xf32>
    %cst = arith.constant dense<0.000000e+00> : vector<8x128xf32>
    %4 = tpu.matmul %2, %3, %cst {dimension_numbers = #tpu.dot_dimension_numbers<[1], [0], [0], [1], [0, 0, 1, 1], [], []>, precision = #tpu.contract_precision<fp32>} : vector<8x128xf32>, vector<128x128xf32>, vector<8x128xf32> -> vector<8x128xf32>
    %5 = math.rsqrt %4 : vector<8x128xf32>
    %6 = arith.mulf %0, %5 : vector<8x128xf32>
    %7 = vector.broadcast %1 : vector<1x128xf32> to vector<8x128xf32>
    %8 = arith.mulf %6, %7 : vector<8x128xf32>
    %c0_5 = arith.constant 0 : index
    %c0_6 = arith.constant 0 : index
    %9 = vector.load %arg4[%c0_5, %c0_6] : memref<8x128xf32, #tpu.memory_space<vmem>>, vector<8x128xf32>
    tpu.vector_store %arg4[%c0_5, %c0_6], %8 {strides = array<i32>} : memref<8x128xf32, #tpu.memory_space<vmem>>, vector<8x128xf32>,
    return
  }
  func.func @transform_0(%arg0: i32) -> (i32, i32) {
    %c0_i32 = arith.constant 0 : i32
    %c0_i32_0 = arith.constant 0 : i32
    return %arg0, %c0_i32 : i32, i32
  }
  func.func @transform_1(%arg0: i32) -> (i32, i32) {
    %c0_i32 = arith.constant 0 : i32
    %c0_i32_0 = arith.constant 0 : i32
    %c0_i32_1 = arith.constant 0 : i32
    return %c0_i32, %c0_i32_0 : i32, i32
  }
  func.func @transform_2(%arg0: i32) -> (i32, i32) {
    %c0_i32 = arith.constant 0 : i32
    %c0_i32_0 = arith.constant 0 : i32
    %c0_i32_1 = arith.constant 0 : i32
    return %c0_i32, %c0_i32_0 : i32, i32
  }
  func.func @transform_3(%arg0: i32) -> (i32, i32) {
    %c0_i32 = arith.constant 0 : i32
    %c0_i32_0 = arith.constant 0 : i32
    return %arg0, %c0_i32 : i32, i32
  }
}

</mosaic_0001>

<bundles_post_ra>
// kernel: tpu_custom_call.1
= control target key start
LH: loop header
LB: loop body
LE: loop exit
PB: predicated region body
PF: predicated region fallthrough
CT: control target
= control target key end

     0   :  { %8 = vsyncpa [#allocation3], 0  ;;  %s858_s0 = inlined_call_operand.hbm [shape: f32[4,128], index: 0, kind: input, shape index: {}]   ;;  %s859_s1 = inlined_call_operand.hbm [shape: f32[1,128], index: 1, kind: input, shape index: {}]   ;;  %s860_s2 = inlined_call_operand.hbm [shape: f32[128,128], index: 2, kind: input, shape index: {}]   ;;  %s861_s3 = inlined_call_operand.hbm [shape: f32[4,128], index: 3, kind: output, shape index: {}]  }
   0x1   :  { %9 = vsyncpa [#allocation6], 0 }
   0x2   :  { %10 = vsyncpa [#allocation4], 0  ;;  %s29_s14 = sshll.u32 %s859_s1, 4  ;;  %s30_s14 = int_to_ptr.hbm [resolvable:$true] %s29_s14 }
   0x3   :  { %14 = vsyncadd [#allocation3], 64  ;;  %s569_s15 = smov [#allocation5]   ;;  %s15_s19 = sshll.u32 %s858_s0, 4  ;;  %s16_s19 = int_to_ptr.hbm [resolvable:$true] %s15_s19 }
   0x4   :  { %s31_s16 = sshll.u32 %s569_s15, 4  ;;  %s570_s20 = smov [#allocation2]   ;;  %s32_s16 = int_to_ptr.vmem [resolvable:$true] %s31_s16 }
   0x5   :  { %34 = dma.hbm_to_vmem [thread:$0]  %s30_s14, 16, %s32_s16, [#allocation6]  }
   0x6   :  { %s17_s21 = sshll.u32 %s570_s20, 4  ;;  %s571_s22 = smov 64   ;;  %s18_s21 = int_to_ptr.vmem [resolvable:$true] %s17_s21 }
   0x7   :  { %s572_s23 = smov 4   ;;  %s39_s25 = sshll.u32 %s860_s2, 4  ;;  %s40_s25 = int_to_ptr.hbm [resolvable:$true] %s39_s25 }
   0x8   :  { %23 = dma.hbm_to_vmem [thread:$0]  %s16_s19, 64, %s18_s21, [#allocation3], %s571_s22, %s571_s22, %s572_s23  }
   0x9   :  { %s573_s26 = smov [#allocation7]   ;;  %s574_s0 = smov 128  }
   0xa   :  { %s41_s27 = sshll.u32 %s573_s26, 4  ;;  %s575_s28 = smov 8   ;;  %s42_s27 = int_to_ptr.vmem [resolvable:$true] %s41_s27 }
   0xb   :  { %47 = dma.hbm_to_vmem [thread:$0]  %s40_s25, 2048, %s42_s27, [#allocation6], %s574_s0, %s574_s0, %s575_s28  }
   0xc   :  { %563 = dma.done.wait [#allocation3], 128  }
   0xd   :  { %564 = vsyncadd [#allocation3], 4294967168 }
   0xe   :  { %565 = dma.done.wait [#allocation6], 2064  }
   0xf   :  { %566 = vsyncadd [#allocation6], 4294965232  ;;  %v78_v0 = vld [vmem:[#allocation7 + $0x78] sm:$0xff]  ;;  %v77_v1 = vld [vmem:[#allocation7 + $0x70] sm:$0xff] }
  0x10   :  { %v76_v2 = vld [vmem:[#allocation7 + $0x68] sm:$0xff]  ;;  %v609_v3 = vand.u32 4294901760, %v78_v0  ;;  %v611_v4 = vand.u32 4294901760, %v77_v1  ;;  %v75_v6 = vld [vmem:[#allocation7 + $0x60] sm:$0xff]  ;;  %v74_v7 = vld [vmem:[#allocation7 + $0x58] sm:$0xff] }
  0x11   :  { %v613_v5 = vand.u32 4294901760, %v76_v2  ;;  %v73_v8 = vld [vmem:[#allocation7 + $0x50] sm:$0xff]  ;;  %v615_v9 = vand.u32 4294901760, %v75_v6  ;;  %v617_v10 = vand.u32 4294901760, %v74_v7  ;;  %v72_v12 = vld [vmem:[#allocation7 + $0x48] sm:$0xff]  ;;  %v71_v13 = vld [vmem:[#allocation7 + $0x40] sm:$0xff] }
  0x12   :  { %v619_v11 = vand.u32 4294901760, %v73_v8  ;;  %80 = vmatpush.msra.mxu0 %v609_v3  ;;  %v623_v14 = vsub.f32 %v78_v0, %v609_v3  ;;  %v626_v15 = vsub.f32 %v77_v1, %v611_v4  ;;  %v631_v17 = vand.u32 4294901760, %v72_v12  ;;  %v70_v18 = vld [vmem:[#allocation7 + $0x38] sm:$0xff]  ;;  %276 = vmatpush.msra.mxu3 %v609_v3  ;;  %v69_v26 = vld [vmem:[#allocation7 + $0x30] sm:$0xff]  ;;  %v68_v36 = vld [vmem:[#allocation7 + $0x28] sm:$0xff] }
  0x13   :  { %v629_v16 = vsub.f32 %v76_v2, %v613_v5  ;;  %v635_v19 = vsub.f32 %v75_v6, %v615_v9  ;;  %v638_v20 = vsub.f32 %v74_v7, %v617_v10  ;;  %v647_v25 = vand.u32 4294901760, %v71_v13  ;;  %v67_v42 = vld [vmem:[#allocation7 + $0x20] sm:$0xff]  ;;  %v66_v47 = vld [vmem:[#allocation7 + $0x18] sm:$0xff]  ;;  %v65_v55 = vld [vmem:[#allocation7 + $0x10] sm:$0xff] }
  0x14   :  { %v641_v21 = vsub.f32 %v73_v8, %v619_v11  ;;  %82 = vmatpush.msra.mxu0 %v611_v4  ;;  %v122_v22 = vand.u32 4294901760, %v623_v14  ;;  %v128_v23 = vand.u32 4294901760, %v626_v15  ;;  %223 = vmatpush.msra.mxu2 %v623_v14  ;;  %v651_v28 = vand.u32 4294901760, %v70_v18  ;;  %v64_v60 = vld [vmem:[#allocation7 + $0x8] sm:$0xff]  ;;  %v721_v61 = vld [vmem:[#allocation2] sm:$0xff]  ;;  %v63_v2 = vld [vmem:[#allocation7] sm:$0xff] }
  0x15   :  { %v134_v24 = vand.u32 4294901760, %v629_v16  ;;  %v140_v27 = vand.u32 4294901760, %v635_v19  ;;  %v654_v29 = vsub.f32 %v72_v12, %v631_v17  ;;  %278 = vmatpush.msra.mxu3 %v611_v4  ;;  %v146_v33 = vand.u32 4294901760, %v638_v20 }
  0x16   :  { %84 = vmatpush.msra.mxu0 %v613_v5  ;;  %v123_v30 = vsub.f32 %v623_v14, %v122_v22  ;;  %v129_v31 = vsub.f32 %v626_v15, %v128_v23  ;;  %226 = vmatpush.msra.mxu2 %v626_v15  ;;  %v152_v34 = vand.u32 4294901760, %v641_v21  ;;  %v670_v35 = vand.u32 4294901760, %v69_v26 }
  0x17   :  { %v135_v32 = vsub.f32 %v629_v16, %v134_v24  ;;  %280 = vmatpush.msra.mxu3 %v613_v5  ;;  %v141_v39 = vsub.f32 %v635_v19, %v140_v27  ;;  %v678_v40 = vsub.f32 %v71_v13, %v647_v25  ;;  %v158_v41 = vand.u32 4294901760, %v654_v29 }
  0x18   :  { %v124_v37 = vand.u32 4294901760, %v123_v30  ;;  %86 = vmatpush.msra.mxu0 %v615_v9  ;;  %v130_v38 = vand.u32 4294901760, %v129_v31  ;;  %229 = vmatpush.msra.mxu2 %v629_v16  ;;  %v147_v44 = vsub.f32 %v638_v20, %v146_v33  ;;  %v687_v45 = vand.u32 4294901760, %v68_v36 }
  0x19   :  { %282 = vmatpush.msra.mxu3 %v615_v9  ;;  %v136_v43 = vand.u32 4294901760, %v135_v32  ;;  %v690_v46 = vsub.f32 %v70_v18, %v651_v28  ;;  %v164_v48 = vand.u32 4294901760, %v678_v40  ;;  %v142_v49 = vand.u32 4294901760, %v141_v39 }
  0x1a   :  { %125 = vmatpush.msra.mxu1 %v124_v37  ;;  %88 = vmatpush.msra.mxu0 %v617_v10  ;;  %v153_v50 = vsub.f32 %v641_v21, %v152_v34  ;;  %v699_v51 = vand.u32 4294901760, %v67_v42  ;;  %v702_v52 = vsub.f32 %v69_v26, %v670_v35  ;;  %v159_v53 = vsub.f32 %v654_v29, %v158_v41 }
  0x1b   :  { %232 = vmatpush.msra.mxu2 %v635_v19  ;;  %284 = vmatpush.msra.mxu3 %v617_v10  ;;  %v707_v54 = vand.u32 4294901760, %v66_v47  ;;  %v148_v56 = vand.u32 4294901760, %v147_v44  ;;  %v170_v57 = vand.u32 4294901760, %v690_v46  ;;  %v714_v58 = vsub.f32 %v68_v36, %v687_v45 }
  0x1c   :  { %131 = vmatpush.msra.mxu1 %v130_v38  ;;  %90 = vmatpush.msra.mxu0 %v619_v11  ;;  %v165_v59 = vsub.f32 %v678_v40, %v164_v48  ;;  %v154_v62 = vand.u32 4294901760, %v153_v50  ;;  %v176_v63 = vand.u32 4294901760, %v702_v52  ;;  %v725_v0 = vand.u32 4294901760, %v65_v55 }
  0x1d   :  { %235 = vmatpush.msra.mxu2 %v638_v20  ;;  %286 = vmatpush.msra.mxu3 %v619_v11  ;;  %v728_v1 = vsub.f32 %v67_v42, %v699_v51  ;;  %v160_v6 = vand.u32 4294901760, %v159_v53  ;;  %v731_v7 = vsub.f32 %v66_v47, %v707_v54  ;;  %v171_v8 = vsub.f32 %v690_v46, %v170_v57 }
  0x1e   :  { %137 = vmatpush.msra.mxu1 %v136_v43  ;;  %92 = vmatpush.msra.mxu0 %v631_v17  ;;  %v182_v12 = vand.u32 4294901760, %v714_v58  ;;  %v740_v13 = vand.u32 4294901760, %v64_v60  ;;  %v62_v18 = vmul.f32 %v721_v61, %v721_v61  ;;  %v166_v26 = vand.u32 4294901760, %v165_v59 }
  0x1f   :  { %238 = vmatpush.msra.mxu2 %v641_v21  ;;  %288 = vmatpush.msra.mxu3 %v631_v17  ;;  %v744_v30 = vand.u32 4294901760, %v63_v2  ;;  %v177_v31 = vsub.f32 %v702_v52, %v176_v63  ;;  %v188_v32 = vand.u32 4294901760, %v728_v1  ;;  %v754_v36 = vsub.f32 %v65_v55, %v725_v0 }
  0x20   :  { %143 = vmatpush.msra.mxu1 %v142_v49  ;;  %94 = vmatpush.msra.mxu0 %v647_v25  ;;  %v756_v37 = vand.u32 4294901760, %v62_v18  ;;  %v194_v38 = vand.u32 4294901760, %v731_v7  ;;  %v172_v39 = vand.u32 4294901760, %v171_v8  ;;  %v183_v42 = vsub.f32 %v714_v58, %v182_v12 }
  0x21   :  { %241 = vmatpush.msra.mxu2 %v654_v29  ;;  %290 = vmatpush.msra.mxu3 %v647_v25  ;;  %v766_v43 = vsub.f32 %v64_v60, %v740_v13  ;;  %v178_v47 = vand.u32 4294901760, %v177_v31  ;;  %v189_v49 = vsub.f32 %v728_v1, %v188_v32  ;;  %v200_v50 = vand.u32 4294901760, %v754_v36 }
  0x22   :  { %149 = vmatpush.msra.mxu1 %v148_v56  ;;  %96 = vmatpush.msra.mxu0 %v651_v28  ;;  %v112_v44 = vsub.f32 %v62_v18, %v756_v37  ;;  %v777_v53 = vsub.f32 %v63_v2, %v744_v30  ;;  %v184_v55 = vand.u32 4294901760, %v183_v42  ;;  %v195_v56 = vsub.f32 %v731_v7, %v194_v38 }
  0x23   :  { %244 = vmatpush.msra.mxu2 %v678_v40  ;;  %292 = vmatpush.msra.mxu3 %v651_v28  ;;  %v206_v59 = vand.u32 4294901760, %v766_v43  ;;  %v201_v2 = vsub.f32 %v754_v36, %v200_v50 }
  0x24   :  { %155 = vmatpush.msra.mxu1 %v154_v62  ;;  %98 = vmatpush.msra.mxu0 %v670_v35  ;;  %v113_v60 = vand.u32 4294901760, %v112_v44  ;;  %v190_v62 = vand.u32 4294901760, %v189_v49  ;;  %v196_v8 = vand.u32 4294901760, %v195_v56 }
  0x25   :  { %247 = vmatpush.msra.mxu2 %v690_v46  ;;  %294 = vmatpush.msra.mxu3 %v670_v35  ;;  %v207_v18 = vsub.f32 %v766_v43, %v206_v59  ;;  %v202_v31 = vand.u32 4294901760, %v201_v2 }
  0x26   :  { %161 = vmatpush.msra.mxu1 %v160_v6  ;;  %100 = vmatpush.msra.mxu0 %v687_v45  ;;  %v212_v6 = vand.u32 4294901760, %v777_v53 }
  0x27   :  { %250 = vmatpush.msra.mxu2 %v702_v52  ;;  %296 = vmatpush.msra.mxu3 %v687_v45  ;;  %v208_v42 = vand.u32 4294901760, %v207_v18 }
  0x28   :  { %167 = vmatpush.msra.mxu1 %v166_v26  ;;  %102 = vmatpush.msra.mxu0 %v699_v51  ;;  %v114_v26 = vsub.f32 %v112_v44, %v113_v60 }
  0x29   :  { %253 = vmatpush.msra.mxu2 %v714_v58  ;;  %298 = vmatpush.msra.mxu3 %v699_v51 }
  0x2a   :  { %173 = vmatpush.msra.mxu1 %v172_v39  ;;  %104 = vmatpush.msra.mxu0 %v707_v54  ;;  %v213_v39 = vsub.f32 %v777_v53, %v212_v6 }
  0x2b   :  { %256 = vmatpush.msra.mxu2 %v728_v1  ;;  %300 = vmatpush.msra.mxu3 %v707_v54 }
  0x2c   :  { %179 = vmatpush.msra.mxu1 %v178_v47  ;;  %106 = vmatpush.msra.mxu0 %v725_v0  ;;  %v115_v47 = vand.u32 4294901760, %v114_v26  ;;  %v214_v49 = vand.u32 4294901760, %v213_v39 }
  0x2d   :  { %259 = vmatpush.msra.mxu2 %v731_v7  ;;  %302 = vmatpush.msra.mxu3 %v725_v0 }
  0x2e   :  { %185 = vmatpush.msra.mxu1 %v184_v55  ;;  %108 = vmatpush.msra.mxu0 %v740_v13 }
  0x2f   :  { %262 = vmatpush.msra.mxu2 %v754_v36  ;;  %304 = vmatpush.msra.mxu3 %v740_v13 }
  0x30   :  { %191 = vmatpush.msra.mxu1 %v190_v62  ;;  %110 = vmatpush.msra.mxu0 %v744_v30 }
  0x31   :  { %265 = vmatpush.msra.mxu2 %v766_v43  ;;  %306 = vmatpush.msra.mxu3 %v744_v30 }
  0x32   :  { %317 = vmatpush.msrb.mxu0 %v122_v22  ;;  %197 = vmatpush.msra.mxu1 %v196_v8 }
  0x33   :  { %268 = vmatpush.msra.mxu2 %v777_v53  ;;  %310 = vmatmul.f32.vlgmr.msra.gmra.mxu3 %v113_v60 }
  0x34   :  { %321 = vmatpush.msrb.mxu0 %v128_v23  ;;  %203 = vmatpush.msra.mxu1 %v202_v31 }
  0x35   :  { %271 = vmatmul.f32.vlgmr.msra.gmra.mxu2 %v112_v44  ;;  %116 = vmatmul.f32.vlgmr.msra.gmra.mxu0 %v115_v47 }
  0x36   :  { %325 = vmatpush.msrb.mxu0 %v134_v24  ;;  %209 = vmatpush.msra.mxu1 %v208_v42 }
  0x38   :  { %329 = vmatpush.msrb.mxu0 %v140_v27  ;;  %215 = vmatpush.msra.mxu1 %v214_v49  ;;  %v464_v27 = vld [vmem:[#allocation5] ss:$0 sm:$0xff] }
  0x39   :  { %217 = vmatmul.f32.vlgmr.msra.gmra.mxu1 %v756_v37 }
  0x3a   :  { %384 = vmatpush.msrb.mxu1 %v609_v3  ;;  %333 = vmatpush.msrb.mxu0 %v146_v33 }
  0x3c   :  { %386 = vmatpush.msrb.mxu1 %v611_v4  ;;  %337 = vmatpush.msrb.mxu0 %v152_v34 }
  0x3e   :  { %388 = vmatpush.msrb.mxu1 %v613_v5  ;;  %341 = vmatpush.msrb.mxu0 %v158_v41 }
  0x40   :  { %390 = vmatpush.msrb.mxu1 %v615_v9  ;;  %345 = vmatpush.msrb.mxu0 %v164_v48 }
  0x42   :  { %392 = vmatpush.msrb.mxu1 %v617_v10  ;;  %349 = vmatpush.msrb.mxu0 %v170_v57 }
  0x44   :  { %394 = vmatpush.msrb.mxu1 %v619_v11  ;;  %353 = vmatpush.msrb.mxu0 %v176_v63 }
  0x46   :  { %396 = vmatpush.msrb.mxu1 %v631_v17  ;;  %357 = vmatpush.msrb.mxu0 %v182_v12 }
  0x48   :  { %398 = vmatpush.msrb.mxu1 %v647_v25  ;;  %361 = vmatpush.msrb.mxu0 %v188_v32 }
  0x4a   :  { %400 = vmatpush.msrb.mxu1 %v651_v28  ;;  %365 = vmatpush.msrb.mxu0 %v194_v38 }
  0x4c   :  { %402 = vmatpush.msrb.mxu1 %v670_v35  ;;  %369 = vmatpush.msrb.mxu0 %v200_v50 }
  0x4e   :  { %404 = vmatpush.msrb.mxu1 %v687_v45  ;;  %373 = vmatpush.msrb.mxu0 %v206_v59 }
  0x50   :  { %406 = vmatpush.msrb.mxu1 %v699_v51  ;;  %377 = vmatpush.msrb.mxu0 %v212_v6 }
  0x51   :  { %379 = vmatmul.f32.vlgmr.msrb.gmra.mxu0 %v756_v37 }
  0x52   :  { %408 = vmatpush.msrb.mxu1 %v707_v54 }
  0x54   :  { %410 = vmatpush.msrb.mxu1 %v725_v0 }
  0x56   :  { %412 = vmatpush.msrb.mxu1 %v740_v13 }
  0x58   :  { %414 = vmatpush.msrb.mxu1 %v744_v30 }
  0x59   :  { %416 = vmatmul.f32.vlgmr.msrb.gmra.mxu1 %v756_v37 }
  0xb2   :  { %v117_v4 = vpop.f32.mrf.mxu0 }
  0xb6   :  { %v218_v3 = vpop.f32.mrf.mxu1  ;;  %v311_v11 = vpop.f32.mrf.mxu3 }
  0xb7   :  { %v219_v5 = vadd.f32 %v218_v3, %v117_v4 }
  0xb8   :  { %v272_v9 = vpop.f32.mrf.mxu2 }
  0xb9   :  { %v273_v10 = vadd.f32 %v272_v9, %v219_v5 }
  0xbb   :  { %v312_v14 = vadd.f32 %v311_v11, %v273_v10 }
  0xce   :  { %v380_v15 = vpop.f32.mrf.mxu0 }
  0xcf   :  { %v381_v16 = vadd.f32 %v380_v15, %v312_v14 }
  0xd6   :  { %v417_v17 = vpop.f32.mrf.mxu1 }
  0xd7   :  { %v418_v19 = vadd.f32 %v417_v17, %v381_v16 }
  0xd9   :  { %465 = vrsqrt.f32 %v418_v19  ;;  %vm426_vm1 = vweird.f32 %v418_v19 }
  0xdf   :  { %v466_v20 = vpop.eup %465 }
  0xe0   :  { %v421_v21 = vmul.f32 %v466_v20, %v418_v19  ;;  %vm427_vm0 = vweird.f32 %v466_v20 }
  0xe1   :  { %vm428_vm2 = vmor %vm426_vm1, %vm427_vm0 }
  0xe2   :  { %v422_v22 = vmul.f32 %v466_v20, %v421_v21 }
  0xe4   :  { %v423_v23 = vmul.f32 0.5, %v422_v22 }
  0xe6   :  { %v424_v24 = vsub.f32 1.5, %v423_v23 }
  0xe8   :  { %v425_v25 = vmul.f32 %v466_v20, %v424_v24 }
  0xea   :  { %v429_v28 = vsel %vm428_vm2, %v466_v20, %v425_v25 }
  0xeb   :  { %v430_v29 = vmul.f32 %v429_v28, %v721_v61 }
  0xed   :  { %v434_v33 = vmul.f32 %v464_v27, %v430_v29 }
  0xef   :  { %435 = vst [vmem:[#allocation8] sm:$0xff] %v434_v33 }
  0xf0   :  { %439 = vsyncadd [#allocation4], 64  ;;  %s442_s30 = sshll.u32 %s861_s3, 4  ;;  %s576_s4 = smov [#allocation8]   ;;  %s443_s30 = int_to_ptr.hbm [resolvable:$true] %s442_s30 }
  0xf1   :  { %s440_s5 = sshll.u32 %s576_s4, 4  ;;  %s441_s5 = int_to_ptr.vmem [resolvable:$true] %s440_s5 }
  0xf2   :  { %448 = dma.vmem_to_hbm [thread:$0]  %s441_s5, 64, %s443_s30, [#allocation4], %s571_s22, %s571_s22, %s572_s23  }
  0xf3   :  { %567 = dma.done.wait [#allocation4], 128  }
  0xf4   :  { %568 = vsyncadd [#allocation4], 4294967168 }
  0xf5   :  { %453 = vsyncpa [#allocation3], 1 }
  0xf6   :  { %454 = vsyncpa [#allocation6], 1 }
  0xf7   :  { %455 = vsyncpa [#allocation4], 1 }

</bundles_post_ra>
